<compile_context>
chip_gen: v5e
topology: v5e:2x2
jax: 0.10.0
libtpu: 0.0.40
codegen_flags: <defaults>
</compile_context>

<pallas_src>
import functools
import math

import jax
import jax.numpy as jnp
from jax.experimental import pallas as pl
from jax.experimental.pallas import tpu as pltpu


def _bce_dice_kernel(posw_ref, x_ref, y_ref, out_ref, acc_ref, *,
                     valid_lanes, num_tiles):
    """Accumulate per-row partial sums for BCE-with-logits + Dice.

    posw_ref: (rows, 1)      per-row posWeight column (f32)
    x_ref:    (rows, tp)     logits slab for one voxel tile
    y_ref:    (rows, tp)     target slab
    out_ref:  (1, 4, rows)   per-core partial sums: [bce, sig*y, sig*sig, y*y]
    acc_ref:  (4, rows, tp)  VMEM vector accumulator (per-lane partials)
    """
    c = pl.program_id(0)          # core-split index ("parallel" axis)
    pi = pl.program_id(1)         # voxel-tile index within this core's range
    inner = pl.num_programs(1)

    @pl.when(pi == 0)
    def _():
        acc_ref[...] = jnp.zeros_like(acc_ref)

    x = x_ref[...].astype(jnp.float32)          # (rows, tp)
    y = y_ref[...].astype(jnp.float32)          # (rows, tp)
    posw = posw_ref[...].astype(jnp.float32)    # (rows, 1) -> lane broadcast

    tp = x.shape[-1]
    tile_idx = c * inner + pi                   # logical voxel-tile index

    def stats(xv, yv):
        # PyTorch-stable BCEWithLogits with elementwise pos_weight = posw*y:
        #   bce = (1-y)*x + (1 + (posw*y - 1)*y) * (log1p(exp(-|x|)) + relu(-x))
        t = jnp.exp(-jnp.abs(xv))               # EUP; shared with sigmoid
        soft = jnp.log1p(t) + jnp.maximum(-xv, 0.0)
        one_m_y = 1.0 - yv
        y2 = yv * yv
        log_w = one_m_y + posw * y2
        bce = one_m_y * xv + log_w * soft
        # stable sigmoid(x) reusing t = exp(-|x|); exact reciprocal (approx
        # rcp error is too close to the rtol=1e-4 validation tolerance).
        inv = 1.0 / (1.0 + t)
        s = jnp.where(xv >= 0, inv, t * inv)
        return bce, s * yv, s * s, y2

    def accumulate(bce, sy, ss, y2):
        acc_ref[0, :, :] += bce                 # sum of BCE terms
        acc_ref[1, :, :] += sy                  # intersect
        acc_ref[2, :, :] += ss                  # sum sigmoid^2
        acc_ref[3, :, :] += y2                  # sum target^2

    # Only the last logical tile (possibly ragged) and clamped redundant tiles
    # (tile_idx >= num_tiles, produced by the cdiv core split) need masking.
    is_edge = tile_idx >= (num_tiles - 1)

    @pl.when(jnp.logical_not(is_edge))
    def _():
        # Steady-state hot path: no iota, no masking.
        accumulate(*stats(x, y))

    @pl.when(is_edge)
    def _():
        lane = jax.lax.broadcasted_iota(jnp.int32, x.shape, 1)
        mask = lane < (valid_lanes - tile_idx * tp)   # all-False when clamped
        xm = jnp.where(mask, x, 0.0)                  # zero BEFORE exp/log so
        ym = jnp.where(mask, y, 0.0)                  # garbage can't make NaN
        bce, sy, ss, y2 = stats(xm, ym)
        # zeroed lanes still yield bce=log(2) and ss=0.25 -> mask those two
        accumulate(jnp.where(mask, bce, 0.0), sy, jnp.where(mask, ss, 0.0), y2)

    @pl.when(pi == inner - 1)
    def _():
        # One-time XLU lane reduce of the vector accumulator -> (4, rows).
        out_ref[0, :, :] = jnp.sum(acc_ref[...], axis=-1)


def multiclass_bce_dice_loss(logits, target, pos_weight, alpha, beta,
                             reduction="mean", eps=1e-6,
                             tile_p=None, num_core_splits=None,
                             vmem_budget_bytes=24 * 1024 * 1024):
    """JAX/Pallas equivalent of MulticlassBCEDiceLoss.forward.

    logits, target: (N, C, D, H, W) (target is the float mask tensor).
    pos_weight: length-3 sequence [backMask, boneMask, fracMask].
    """
    assert logits.shape == target.shape, "input/target must have the same shape"
    N, C = logits.shape[0], logits.shape[1]
    assert C >= 3, "module scales channels 0..2, so C >= 3 is required"
    dhw = int(math.prod(logits.shape[2:]))

    if reduction not in ("mean", "sum"):
        # TODO(synk): reduction='none' (per-element BCE tensor) is not
        # implemented in the fused reduction kernel.
        raise NotImplementedError("reduction must be 'mean' or 'sum'")

    # Per-channel posWeight (channels >= 3 keep pos_weight = target, scale 1).
    pw3 = jnp.asarray(pos_weight, jnp.float32).reshape(-1)
    assert pw3.shape[0] == 3
    posw_c = jnp.concatenate([pw3, jnp.ones((C - 3,), jnp.float32)])

    # --- Sublane densification: fold batch (and a small spatial factor) into
    # the row axis so rows is a multiple of 8 whenever dhw allows it.
    R0 = N * C
    need = 8 // math.gcd(R0, 8)
    rs = need if (need > 1 and dhw % need == 0) else 1
    rows = R0 * rs
    dhw_r = dhw // rs

    # Free reshapes only -- no transpose / astype / pad of the big tensors.
    x = logits.reshape(rows, dhw_r)
    y = target.reshape(rows, dhw_r)
    # Row r = (n*C + c)*rs + s  ->  channel c; tiny (rows, 1) column.
    posw = jnp.broadcast_to(posw_c[None, :, None], (N, C, rs)).reshape(rows, 1)

    # --- Core split: 2 TensorCores on v7x, 1 on v5e/v6e.
    if num_core_splits is None:
        try:
            kind = jax.devices()[0].device_kind.lower()
        except Exception:
            kind = ""
        num_core_splits = 2 if ("v7" in kind or "7x" in kind) else 1
    nsplit = max(1, int(num_core_splits))

    # --- Lane tile sized from a VMEM byte budget (inputs double-buffered,
    # accumulator sublane-padded f32).  32 MiB scoped VMEM is legal on
    # v5e/v6e/v7x; the budget leaves headroom for posw/output buffers.
    xb = jnp.dtype(logits.dtype).itemsize
    yb = jnp.dtype(target.dtype).itemsize
    rows_pad = -(-rows // 8) * 8
    bytes_per_lane = 2 * rows * (xb + yb) + 4 * rows_pad * 4
    if tile_p is None:
        tile_p = max(128, (vmem_budget_bytes // bytes_per_lane) // 128 * 128)
    if dhw_r <= tile_p:
        tp = dhw_r                      # full extent: always a legal block
    else:
        tp = max(128, (int(tile_p) // 128) * 128)

    num_tiles = int(pl.cdiv(dhw_r, tp))
    nsplit = max(1, min(nsplit, num_tiles))   # no redundant tail on 1-TC chips
    inner_tiles = int(pl.cdiv(num_tiles, nsplit))

    def slab_map(c, pi):
        # Clamp so the DMA always stays in-bounds; fully-redundant tiles are
        # zeroed by the in-kernel edge mask.
        return (0, jnp.minimum(c * inner_tiles + pi, num_tiles - 1))

    kernel = functools.partial(_bce_dice_kernel,
                               valid_lanes=dhw_r, num_tiles=num_tiles)
    partial_sums = pl.pallas_call(
        kernel,
        out_shape=jax.ShapeDtypeStruct((nsplit, 4, rows), jnp.float32),
        grid_spec=pltpu.PrefetchScalarGridSpec(
            num_scalar_prefetch=0,
            grid=(nsplit, inner_tiles),
            in_specs=[
                pl.BlockSpec((rows, 1), lambda c, pi: (0, 0)),    # posWeight
                pl.BlockSpec((rows, tp), slab_map),               # logits
                pl.BlockSpec((rows, tp), slab_map),               # target
            ],
            out_specs=pl.BlockSpec((1, 4, rows), lambda c, pi: (c, 0, 0)),
            scratch_shapes=[pltpu.VMEM((4, rows, tp), jnp.float32)],
        ),
        compiler_params=pltpu.CompilerParams(
            dimension_semantics=("parallel", "arbitrary"),
            vmem_limit_bytes=32 * 1024 * 1024),
    )(posw, x, y)

    # Tiny final combine in plain JAX: fold rows back to (N, C, rs).
    sums = jnp.sum(partial_sums, axis=0).reshape(4, N, C, rs)
    per_channel = jnp.sum(sums, axis=(1, 3))              # (4, C)
    bce_sum = jnp.sum(per_channel[0])
    intersect, in_sq, tgt_sq = per_channel[1], per_channel[2], per_channel[3]

    if reduction == "mean":
        bce = bce_sum / float(N * C * dhw)
    else:  # "sum"
        bce = bce_sum

    dice_c = 2.0 * intersect / jnp.maximum(in_sq + tgt_sq, eps)
    # DiceLoss.forward = 1 - mean(1 - dice_coeff) = mean(dice_coeff)
    dice_term = jnp.mean(dice_c)

    return alpha * bce + beta * dice_term


def _reference(logits, target, pos_weight, alpha, beta,
               reduction="mean", eps=1e-6):
    """Pure-JAX reference reproducing the PyTorch module's forward."""
    x = logits.astype(jnp.float32)
    y = target.astype(jnp.float32)
    C = x.shape[1]
    pw3 = jnp.asarray(pos_weight, jnp.float32).reshape(-1)
    pw_c = jnp.concatenate([pw3, jnp.ones((C - 3,), jnp.float32)])
    pw_full = y * pw_c.reshape((1, C) + (1,) * (x.ndim - 2))  # target * posW
    bce_el = -(pw_full * y * jax.nn.log_sigmoid(x)
               + (1.0 - y) * jax.nn.log_sigmoid(-x))
    bce = jnp.mean(bce_el) if reduction == "mean" else jnp.sum(bce_el)

    s = jax.nn.sigmoid(x)
    axes = (0,) + tuple(range(2, x.ndim))
    intersect = jnp.sum(s * y, axis=axes)
    denom = jnp.sum(s * s, axis=axes) + jnp.sum(y * y, axis=axes)
    dice_c = 2.0 * intersect / jnp.maximum(denom, eps)
    dice_term = jnp.mean(dice_c)   # 1 - mean(1 - dice_c)
    return alpha * bce + beta * dice_term


if __name__ == "__main__":
    key = jax.random.PRNGKey(0)
    k1, k2 = jax.random.split(key)

    alpha, beta = 0.7, 0.3
    pos_weight = (1.0, 2.0, 4.0)   # [backMask, boneMask, fracMask]

    # Test 1: aligned shape, default (auto) tiling / core split.
    N, C, D, H, W = 2, 3, 8, 16, 16
    logits = jax.random.normal(k1, (N, C, D, H, W), jnp.float32)
    target = jax.random.bernoulli(k2, 0.4, (N, C, D, H, W)).astype(jnp.float32)

    loss = multiclass_bce_dice_loss(logits, target, pos_weight,
                                    alpha, beta, reduction="mean")
    loss = jax.block_until_ready(loss)
    ref = _reference(logits, target, pos_weight, alpha, beta, reduction="mean")
    assert jnp.allclose(loss, ref, rtol=1e-4, atol=1e-5), (loss, ref)

    # Test 2: ragged voxel tiling + forced 2-way split (exercises the masked
    # edge path and the clamped redundant tiles), reduction='sum'.
    D2, H2, W2 = 8, 16, 17
    logits2 = jax.random.normal(k1, (N, C, D2, H2, W2), jnp.float32)
    target2 = jax.random.bernoulli(k2, 0.3, (N, C, D2, H2, W2)).astype(jnp.float32)
    loss2 = multiclass_bce_dice_loss(logits2, target2, pos_weight, alpha, beta,
                                     reduction="sum", tile_p=256,
                                     num_core_splits=2)
    loss2 = jax.block_until_ready(loss2)
    ref2 = _reference(logits2, target2, pos_weight, alpha, beta, reduction="sum")
    assert jnp.allclose(loss2, ref2, rtol=1e-4, atol=1e-4), (loss2, ref2)

    print("KERNEL_OK")
</pallas_src>

<mosaic_0001>
module attributes {stable_mosaic.version = 11 : i64} {
  func.func @_bce_dice_kernel(%arg0: i32, %arg1: i32, %arg2: memref<24x1xf32, #tpu.memory_space<vmem>>, %arg3: memref<24x512xf32, #tpu.memory_space<vmem>>, %arg4: memref<24x512xf32, #tpu.memory_space<vmem>>, %arg5: memref<1x4x24xf32, #tpu.memory_space<vmem>>, %arg6: memref<4x24x512xf32, #tpu.memory_space<vmem>>) attributes {dimension_semantics = [#tpu.dimension_semantics<parallel>, #tpu.dimension_semantics<arbitrary>], iteration_bounds = array<i64: 1, 1>, scalar_prefetch = 0 : i64, scratch_operands = 1 : i64, tpu.core_type = #tpu.core_type<tc>, window_params = [{pipeline_mode = #tpu.pipeline_mode<synchronous>, transform_indices = @transform_0, window_bounds = array<i64: 24, 1>}, {transform_indices = @transform_1, window_bounds = array<i64: 24, 512>}, {transform_indices = @transform_2, window_bounds = array<i64: 24, 512>}, {transform_indices = @transform_3, window_bounds = array<i64: 1, 4, 24>}]} {
    %c0_i32 = arith.constant 0 : i32
    %0 = arith.cmpi eq, %arg1, %c0_i32 : i32
    %1 = arith.extui %0 : i1 to i32
    %c0_i32_0 = arith.constant 0 : i32
    %2 = arith.cmpi ne, %1, %c0_i32_0 : i32
    scf.if %2 {
      %cst = arith.constant 0.000000e+00 : f32
      %17 = vector.broadcast %cst : f32 to vector<4x24x512xf32>
      %c0_11 = arith.constant 0 : index
      %c0_12 = arith.constant 0 : index
      %c0_13 = arith.constant 0 : index
      %18 = vector.load %arg6[%c0_11, %c0_12, %c0_13] : memref<4x24x512xf32, #tpu.memory_space<vmem>>, vector<4x24x512xf32>
      tpu.vector_store %arg6[%c0_11, %c0_12, %c0_13], %17 {strides = array<i32>} : memref<4x24x512xf32, #tpu.memory_space<vmem>>, vector<4x24x512xf32>,
    } else {
    }
    %c0 = arith.constant 0 : index
    %c0_1 = arith.constant 0 : index
    %3 = vector.load %arg3[%c0, %c0_1] : memref<24x512xf32, #tpu.memory_space<vmem>>, vector<24x512xf32>
    %c0_2 = arith.constant 0 : index
    %c0_3 = arith.constant 0 : index
    %4 = vector.load %arg4[%c0_2, %c0_3] : memref<24x512xf32, #tpu.memory_space<vmem>>, vector<24x512xf32>
    %c0_4 = arith.constant 0 : index
    %c0_5 = arith.constant 0 : index
    %5 = vector.load %arg2[%c0_4, %c0_5] : memref<24x1xf32, #tpu.memory_space<vmem>>, vector<24x1xf32>
    %c1_i32 = arith.constant 1 : i32
    %6 = arith.muli %arg0, %c1_i32 : i32
    %7 = arith.addi %6, %arg1 : i32
    %c0_i32_6 = arith.constant 0 : i32
    %8 = arith.cmpi sge, %7, %c0_i32_6 : i32
    %true = arith.constant true
    %9 = arith.xori %8, %true : i1
    %10 = arith.extui %9 : i1 to i32
    %c0_i32_7 = arith.constant 0 : i32
    %11 = arith.cmpi ne, %10, %c0_i32_7 : i32
    scf.if %11 {
      %17 = math.absf %3 : vector<24x512xf32>
      %cst = arith.constant 0.000000e+00 : f32
      %18 = vector.broadcast %cst : f32 to vector<24x512xf32>
      %19 = arith.subf %18, %17 : vector<24x512xf32>
      %20 = math.exp %19 : vector<24x512xf32>
      %21 = math.log1p %20 : vector<24x512xf32>
      %cst_11 = arith.constant 0.000000e+00 : f32
      %22 = vector.broadcast %cst_11 : f32 to vector<24x512xf32>
      %23 = arith.subf %22, %3 : vector<24x512xf32>
      %cst_12 = arith.constant 0.000000e+00 : f32
      %24 = vector.broadcast %cst_12 : f32 to vector<24x512xf32>
      %25 = arith.maximumf %23, %24 : vector<24x512xf32>
      %26 = arith.addf %21, %25 : vector<24x512xf32>
      %cst_13 = arith.constant 1.000000e+00 : f32
      %27 = vector.broadcast %cst_13 : f32 to vector<24x512xf32>
      %28 = arith.subf %27, %4 : vector<24x512xf32>
      %29 = arith.mulf %4, %4 : vector<24x512xf32>
      %30 = vector.broadcast %5 : vector<24x1xf32> to vector<24x512xf32>
      %31 = arith.mulf %30, %29 : vector<24x512xf32>
      %32 = arith.addf %28, %31 : vector<24x512xf32>
      %33 = arith.mulf %28, %3 : vector<24x512xf32>
      %34 = arith.mulf %32, %26 : vector<24x512xf32>
      %35 = arith.addf %33, %34 : vector<24x512xf32>
      %cst_14 = arith.constant 1.000000e+00 : f32
      %36 = vector.broadcast %cst_14 : f32 to vector<24x512xf32>
      %37 = arith.addf %36, %20 : vector<24x512xf32>
      %cst_15 = arith.constant 1.000000e+00 : f32
      %38 = vector.broadcast %cst_15 : f32 to vector<24x512xf32>
      %39 = arith.divf %38, %37 : vector<24x512xf32>
      %cst_16 = arith.constant 0.000000e+00 : f32
      %40 = vector.broadcast %cst_16 : f32 to vector<24x512xf32>
      %41 = arith.cmpf oge, %3, %40 : vector<24x512xf32>
      %42 = arith.mulf %20, %39 : vector<24x512xf32>
      %43 = arith.select %41, %39, %42 : vector<24x512xi1>, vector<24x512xf32>
      %44 = arith.mulf %43, %4 : vector<24x512xf32>
      %45 = arith.mulf %43, %43 : vector<24x512xf32>
      %c0_17 = arith.constant 0 : index
      %c0_18 = arith.constant 0 : index
      %c0_19 = arith.constant 0 : index
      %46 = vector.load %arg6[%c0_17, %c0_18, %c0_19] : memref<4x24x512xf32, #tpu.memory_space<vmem>>, vector<1x24x512xf32>
      %47 = vector.shape_cast %46 : vector<1x24x512xf32> to vector<24x512xf32>
      %48 = arith.addf %47, %35 : vector<24x512xf32>
      %c0_20 = arith.constant 0 : index
      %c0_21 = arith.constant 0 : index
      %c0_22 = arith.constant 0 : index
      %49 = vector.load %arg6[%c0_20, %c0_21, %c0_22] : memref<4x24x512xf32, #tpu.memory_space<vmem>>, vector<1x24x512xf32>
      %50 = vector.shape_cast %49 : vector<1x24x512xf32> to vector<24x512xf32>
      %51 = vector.shape_cast %48 : vector<24x512xf32> to vector<1x24x512xf32>
      tpu.vector_store %arg6[%c0_20, %c0_21, %c0_22], %51 {strides = array<i32>} : memref<4x24x512xf32, #tpu.memory_space<vmem>>, vector<1x24x512xf32>,
      %c1 = arith.constant 1 : index
      %c0_23 = arith.constant 0 : index
      %c0_24 = arith.constant 0 : index
      %52 = vector.load %arg6[%c1, %c0_23, %c0_24] : memref<4x24x512xf32, #tpu.memory_space<vmem>>, vector<1x24x512xf32>
      %53 = vector.shape_cast %52 : vector<1x24x512xf32> to vector<24x512xf32>
      %54 = arith.addf %53, %44 : vector<24x512xf32>
      %c1_25 = arith.constant 1 : index
      %c0_26 = arith.constant 0 : index
      %c0_27 = arith.constant 0 : index
      %55 = vector.load %arg6[%c1_25, %c0_26, %c0_27] : memref<4x24x512xf32, #tpu.memory_space<vmem>>, vector<1x24x512xf32>
      %56 = vector.shape_cast %55 : vector<1x24x512xf32> to vector<24x512xf32>
      %57 = vector.shape_cast %54 : vector<24x512xf32> to vector<1x24x512xf32>
      tpu.vector_store %arg6[%c1_25, %c0_26, %c0_27], %57 {strides = array<i32>} : memref<4x24x512xf32, #tpu.memory_space<vmem>>, vector<1x24x512xf32>,
      %c2 = arith.constant 2 : index
      %c0_28 = arith.constant 0 : index
      %c0_29 = arith.constant 0 : index
      %58 = vector.load %arg6[%c2, %c0_28, %c0_29] : memref<4x24x512xf32, #tpu.memory_space<vmem>>, vector<1x24x512xf32>
      %59 = vector.shape_cast %58 : vector<1x24x512xf32> to vector<24x512xf32>
      %60 = arith.addf %59, %45 : vector<24x512xf32>
      %c2_30 = arith.constant 2 : index
      %c0_31 = arith.constant 0 : index
      %c0_32 = arith.constant 0 : index
      %61 = vector.load %arg6[%c2_30, %c0_31, %c0_32] : memref<4x24x512xf32, #tpu.memory_space<vmem>>, vector<1x24x512xf32>
      %62 = vector.shape_cast %61 : vector<1x24x512xf32> to vector<24x512xf32>
      %63 = vector.shape_cast %60 : vector<24x512xf32> to vector<1x24x512xf32>
      tpu.vector_store %arg6[%c2_30, %c0_31, %c0_32], %63 {strides = array<i32>} : memref<4x24x512xf32, #tpu.memory_space<vmem>>, vector<1x24x512xf32>,
      %c3 = arith.constant 3 : index
      %c0_33 = arith.constant 0 : index
      %c0_34 = arith.constant 0 : index
      %64 = vector.load %arg6[%c3, %c0_33, %c0_34] : memref<4x24x512xf32, #tpu.memory_space<vmem>>, vector<1x24x512xf32>
      %65 = vector.shape_cast %64 : vector<1x24x512xf32> to vector<24x512xf32>
      %66 = arith.addf %65, %29 : vector<24x512xf32>
      %c3_35 = arith.constant 3 : index
      %c0_36 = arith.constant 0 : index
      %c0_37 = arith.constant 0 : index
      %67 = vector.load %arg6[%c3_35, %c0_36, %c0_37] : memref<4x24x512xf32, #tpu.memory_space<vmem>>, vector<1x24x512xf32>
      %68 = vector.shape_cast %67 : vector<1x24x512xf32> to vector<24x512xf32>
      %69 = vector.shape_cast %66 : vector<24x512xf32> to vector<1x24x512xf32>
      tpu.vector_store %arg6[%c3_35, %c0_36, %c0_37], %69 {strides = array<i32>} : memref<4x24x512xf32, #tpu.memory_space<vmem>>, vector<1x24x512xf32>,
    } else {
    }
    %12 = arith.extui %8 : i1 to i32
    %c0_i32_8 = arith.constant 0 : i32
    %13 = arith.cmpi ne, %12, %c0_i32_8 : i32
    scf.if %13 {
      %17 = tpu.iota {dimensions = array<i32: 1>} : vector<24x512xi32>
      %c512_i32 = arith.constant 512 : i32
      %18 = arith.muli %7, %c512_i32 : i32
      %c512_i32_11 = arith.constant 512 : i32
      %19 = arith.subi %c512_i32_11, %18 : i32
      %20 = vector.broadcast %19 : i32 to vector<24x512xi32>
      %21 = arith.cmpi slt, %17, %20 : vector<24x512xi32>
      %cst = arith.constant 0.000000e+00 : f32
      %22 = vector.broadcast %cst : f32 to vector<24x512xf32>
      %23 = arith.select %21, %3, %22 : vector<24x512xi1>, vector<24x512xf32>
      %cst_12 = arith.constant 0.000000e+00 : f32
      %24 = vector.broadcast %cst_12 : f32 to vector<24x512xf32>
      %25 = arith.select %21, %4, %24 : vector<24x512xi1>, vector<24x512xf32>
      %26 = math.absf %23 : vector<24x512xf32>
      %cst_13 = arith.constant 0.000000e+00 : f32
      %27 = vector.broadcast %cst_13 : f32 to vector<24x512xf32>
      %28 = arith.subf %27, %26 : vector<24x512xf32>
      %29 = math.exp %28 : vector<24x512xf32>
      %30 = math.log1p %29 : vector<24x512xf32>
      %cst_14 = arith.constant 0.000000e+00 : f32
      %31 = vector.broadcast %cst_14 : f32 to vector<24x512xf32>
      %32 = arith.subf %31, %23 : vector<24x512xf32>
      %cst_15 = arith.constant 0.000000e+00 : f32
      %33 = vector.broadcast %cst_15 : f32 to vector<24x512xf32>
      %34 = arith.maximumf %32, %33 : vector<24x512xf32>
      %35 = arith.addf %30, %34 : vector<24x512xf32>
      %cst_16 = arith.constant 1.000000e+00 : f32
      %36 = vector.broadcast %cst_16 : f32 to vector<24x512xf32>
      %37 = arith.subf %36, %25 : vector<24x512xf32>
      %38 = arith.mulf %25, %25 : vector<24x512xf32>
      %39 = vector.broadcast %5 : vector<24x1xf32> to vector<24x512xf32>
      %40 = arith.mulf %39, %38 : vector<24x512xf32>
      %41 = arith.addf %37, %40 : vector<24x512xf32>
      %42 = arith.mulf %37, %23 : vector<24x512xf32>
      %43 = arith.mulf %41, %35 : vector<24x512xf32>
      %44 = arith.addf %42, %43 : vector<24x512xf32>
      %cst_17 = arith.constant 1.000000e+00 : f32
      %45 = vector.broadcast %cst_17 : f32 to vector<24x512xf32>
      %46 = arith.addf %45, %29 : vector<24x512xf32>
      %cst_18 = arith.constant 1.000000e+00 : f32
      %47 = vector.broadcast %cst_18 : f32 to vector<24x512xf32>
      %48 = arith.divf %47, %46 : vector<24x512xf32>
      %cst_19 = arith.constant 0.000000e+00 : f32
      %49 = vector.broadcast %cst_19 : f32 to vector<24x512xf32>
      %50 = arith.cmpf oge, %23, %49 : vector<24x512xf32>
      %51 = arith.mulf %29, %48 : vector<24x512xf32>
      %52 = arith.select %50, %48, %51 : vector<24x512xi1>, vector<24x512xf32>
      %53 = arith.mulf %52, %25 : vector<24x512xf32>
      %54 = arith.mulf %52, %52 : vector<24x512xf32>
      %cst_20 = arith.constant 0.000000e+00 : f32
      %55 = vector.broadcast %cst_20 : f32 to vector<24x512xf32>
      %56 = arith.select %21, %44, %55 : vector<24x512xi1>, vector<24x512xf32>
      %cst_21 = arith.constant 0.000000e+00 : f32
      %57 = vector.broadcast %cst_21 : f32 to vector<24x512xf32>
      %58 = arith.select %21, %54, %57 : vector<24x512xi1>, vector<24x512xf32>
      %c0_22 = arith.constant 0 : index
      %c0_23 = arith.constant 0 : index
      %c0_24 = arith.constant 0 : index
      %59 = vector.load %arg6[%c0_22, %c0_23, %c0_24] : memref<4x24x512xf32, #tpu.memory_space<vmem>>, vector<1x24x512xf32>
      %60 = vector.shape_cast %59 : vector<1x24x512xf32> to vector<24x512xf32>
      %61 = arith.addf %60, %56 : vector<24x512xf32>
      %c0_25 = arith.constant 0 : index
      %c0_26 = arith.constant 0 : index
      %c0_27 = arith.constant 0 : index
      %62 = vector.load %arg6[%c0_25, %c0_26, %c0_27] : memref<4x24x512xf32, #tpu.memory_space<vmem>>, vector<1x24x512xf32>
      %63 = vector.shape_cast %62 : vector<1x24x512xf32> to vector<24x512xf32>
      %64 = vector.shape_cast %61 : vector<24x512xf32> to vector<1x24x512xf32>
      tpu.vector_store %arg6[%c0_25, %c0_26, %c0_27], %64 {strides = array<i32>} : memref<4x24x512xf32, #tpu.memory_space<vmem>>, vector<1x24x512xf32>,
      %c1 = arith.constant 1 : index
      %c0_28 = arith.constant 0 : index
      %c0_29 = arith.constant 0 : index
      %65 = vector.load %arg6[%c1, %c0_28, %c0_29] : memref<4x24x512xf32, #tpu.memory_space<vmem>>, vector<1x24x512xf32>
      %66 = vector.shape_cast %65 : vector<1x24x512xf32> to vector<24x512xf32>
      %67 = arith.addf %66, %53 : vector<24x512xf32>
      %c1_30 = arith.constant 1 : index
      %c0_31 = arith.constant 0 : index
      %c0_32 = arith.constant 0 : index
      %68 = vector.load %arg6[%c1_30, %c0_31, %c0_32] : memref<4x24x512xf32, #tpu.memory_space<vmem>>, vector<1x24x512xf32>
      %69 = vector.shape_cast %68 : vector<1x24x512xf32> to vector<24x512xf32>
      %70 = vector.shape_cast %67 : vector<24x512xf32> to vector<1x24x512xf32>
      tpu.vector_store %arg6[%c1_30, %c0_31, %c0_32], %70 {strides = array<i32>} : memref<4x24x512xf32, #tpu.memory_space<vmem>>, vector<1x24x512xf32>,
      %c2 = arith.constant 2 : index
      %c0_33 = arith.constant 0 : index
      %c0_34 = arith.constant 0 : index
      %71 = vector.load %arg6[%c2, %c0_33, %c0_34] : memref<4x24x512xf32, #tpu.memory_space<vmem>>, vector<1x24x512xf32>
      %72 = vector.shape_cast %71 : vector<1x24x512xf32> to vector<24x512xf32>
      %73 = arith.addf %72, %58 : vector<24x512xf32>
      %c2_35 = arith.constant 2 : index
      %c0_36 = arith.constant 0 : index
      %c0_37 = arith.constant 0 : index
      %74 = vector.load %arg6[%c2_35, %c0_36, %c0_37] : memref<4x24x512xf32, #tpu.memory_space<vmem>>, vector<1x24x512xf32>
      %75 = vector.shape_cast %74 : vector<1x24x512xf32> to vector<24x512xf32>
      %76 = vector.shape_cast %73 : vector<24x512xf32> to vector<1x24x512xf32>
      tpu.vector_store %arg6[%c2_35, %c0_36, %c0_37], %76 {strides = array<i32>} : memref<4x24x512xf32, #tpu.memory_space<vmem>>, vector<1x24x512xf32>,
      %c3 = arith.constant 3 : index
      %c0_38 = arith.constant 0 : index
      %c0_39 = arith.constant 0 : index
      %77 = vector.load %arg6[%c3, %c0_38, %c0_39] : memref<4x24x512xf32, #tpu.memory_space<vmem>>, vector<1x24x512xf32>
      %78 = vector.shape_cast %77 : vector<1x24x512xf32> to vector<24x512xf32>
      %79 = arith.addf %78, %38 : vector<24x512xf32>
      %c3_40 = arith.constant 3 : index
      %c0_41 = arith.constant 0 : index
      %c0_42 = arith.constant 0 : index
      %80 = vector.load %arg6[%c3_40, %c0_41, %c0_42] : memref<4x24x512xf32, #tpu.memory_space<vmem>>, vector<1x24x512xf32>
      %81 = vector.shape_cast %80 : vector<1x24x512xf32> to vector<24x512xf32>
      %82 = vector.shape_cast %79 : vector<24x512xf32> to vector<1x24x512xf32>
      tpu.vector_store %arg6[%c3_40, %c0_41, %c0_42], %82 {strides = array<i32>} : memref<4x24x512xf32, #tpu.memory_space<vmem>>, vector<1x24x512xf32>,
    } else {
    }
    %c0_i32_9 = arith.constant 0 : i32
    %14 = arith.cmpi eq, %arg1, %c0_i32_9 : i32
    %15 = arith.extui %14 : i1 to i32
    %c0_i32_10 = arith.constant 0 : i32
    %16 = arith.cmpi ne, %15, %c0_i32_10 : i32
    scf.if %16 {
      %c0_11 = arith.constant 0 : index
      %c0_12 = arith.constant 0 : index
      %c0_13 = arith.constant 0 : index
      %17 = vector.load %arg6[%c0_11, %c0_12, %c0_13] : memref<4x24x512xf32, #tpu.memory_space<vmem>>, vector<4x24x512xf32>
      %cst = arith.constant dense<0.000000e+00> : vector<4x24xf32>
      %18 = vector.multi_reduction <add>, %17, %cst [2] : vector<4x24x512xf32> to vector<4x24xf32>
      %c0_14 = arith.constant 0 : index
      %c0_15 = arith.constant 0 : index
      %c0_16 = arith.constant 0 : index
      %19 = vector.load %arg5[%c0_14, %c0_15, %c0_16] : memref<1x4x24xf32, #tpu.memory_space<vmem>>, vector<1x4x24xf32>
      %20 = vector.shape_cast %19 : vector<1x4x24xf32> to vector<4x24xf32>
      %21 = vector.shape_cast %18 : vector<4x24xf32> to vector<1x4x24xf32>
      tpu.vector_store %arg5[%c0_14, %c0_15, %c0_16], %21 {strides = array<i32>} : memref<1x4x24xf32, #tpu.memory_space<vmem>>, vector<1x4x24xf32>,
    } else {
    }
    return
  }
  func.func @transform_0(%arg0: i32, %arg1: i32) -> (i32, i32) {
    %c0_i32 = arith.constant 0 : i32
    %c0_i32_0 = arith.constant 0 : i32
    %c0_i32_1 = arith.constant 0 : i32
    return %c0_i32, %c0_i32_0 : i32, i32
  }
  func.func @transform_1(%arg0: i32, %arg1: i32) -> (i32, i32) {
    %c1_i32 = arith.constant 1 : i32
    %0 = arith.muli %arg0, %c1_i32 : i32
    %1 = arith.addi %0, %arg1 : i32
    %c0_i32 = arith.constant 0 : i32
    %2 = arith.minsi %1, %c0_i32 : i32
    %c0_i32_0 = arith.constant 0 : i32
    %c0_i32_1 = arith.constant 0 : i32
    return %c0_i32_0, %2 : i32, i32
  }
  func.func @transform_2(%arg0: i32, %arg1: i32) -> (i32, i32) {
    %c1_i32 = arith.constant 1 : i32
    %0 = arith.muli %arg0, %c1_i32 : i32
    %1 = arith.addi %0, %arg1 : i32
    %c0_i32 = arith.constant 0 : i32
    %2 = arith.minsi %1, %c0_i32 : i32
    %c0_i32_0 = arith.constant 0 : i32
    %c0_i32_1 = arith.constant 0 : i32
    return %c0_i32_0, %2 : i32, i32
  }
  func.func @transform_3(%arg0: i32, %arg1: i32) -> (i32, i32, i32) {
    %c0_i32 = arith.constant 0 : i32
    %c0_i32_0 = arith.constant 0 : i32
    %c0_i32_1 = arith.constant 0 : i32
    return %arg0, %c0_i32, %c0_i32_0 : i32, i32, i32
  }
}

</mosaic_0001>

<bundles_post_ra>
// kernel: tpu_custom_call.1
= control target key start
LH: loop header
LB: loop body
LE: loop exit
PB: predicated region body
PF: predicated region fallthrough
CT: control target
= control target key end

     0   :  { %8 = vsyncpa [#allocation4], 0  ;;  %s2760_s0 = inlined_call_operand.vmem [shape: f32[24,1], index: 0, kind: input, shape index: {}]   ;;  %s2761_s1 = inlined_call_operand.hbm [shape: f32[24,512], index: 1, kind: input, shape index: {}]   ;;  %s2762_s2 = inlined_call_operand.hbm [shape: f32[24,512], index: 2, kind: input, shape index: {}]   ;;  %s2763_s3 = inlined_call_operand.hbm [shape: f32[1,4,24], index: 3, kind: output, shape index: {}]  }
   0x1   :  { %9 = vsyncpa [#allocation7], 0 }
   0x2   :  { %10 = vsyncpa [#allocation5], 0  ;;  %s23_s14 = sshll.u32 %s2761_s1, 4  ;;  %s1937_s15 = smov [#allocation3]   ;;  %s24_s14 = int_to_ptr.hbm [resolvable:$true] %s23_s14 }
   0x3   :  { %s25_s16 = sshll.u32 %s1937_s15, 4  ;;  %s42_s19 = sshll.u32 %s2762_s2, 4  ;;  %s26_s16 = int_to_ptr.vmem [resolvable:$true] %s25_s16  ;;  %s43_s19 = int_to_ptr.hbm [resolvable:$true] %s42_s19 }
   0x4   :  { %s1938_s20 = smov 512   ;;  %s1939_s21 = smov 32  }
   0x5   :  { %31 = dma.hbm_to_vmem [thread:$0]  %s24_s14, 1536, %s26_s16, [#allocation4], %s1938_s20, %s1938_s20, %s1939_s21  }
   0x6   :  { %s1940_s22 = smov [#allocation6]  }
   0x7   :  { %s44_s23 = sshll.u32 %s1940_s22, 4  ;;  %s45_s23 = int_to_ptr.vmem [resolvable:$true] %s44_s23 }
   0x8   :  { %50 = dma.hbm_to_vmem [thread:$0]  %s43_s19, 1536, %s45_s23, [#allocation7], %s1938_s20, %s1938_s20, %s1939_s21  }
   0x9   :  { %1931 = dma.done.wait [#allocation4], 1536  }
   0xa   :  { %1932 = vsyncadd [#allocation4], 4294965760 }
   0xb   :  { %1933 = dma.done.wait [#allocation7], 1536  }
   0xc   :  { %1934 = vsyncadd [#allocation7], 4294965760  ;;  %v1941_v0 = vmov 0   ;;  %v143_v1 = vld [vmem:[%s2760_s0] sm:$0xff]  ;;  %v145_v2 = vld [vmem:[%s2760_s0 + $0x10] sm:$0xff]  ;;  %s1760_s4 = sshll.u32 %s2763_s3, 4  ;;  %s1761_s4 = int_to_ptr.hbm [resolvable:$true] %s1760_s4 }
   0xd   :  { %1781 = vset.pattern.permute.xlu0 %v1941_v0  ;;  %1782 = vset.pattern.permute.xlu1 %v1941_v0  ;;  %v1975_v3 = vld [vmem:[#allocation3] sm:$0xff]  ;;  %v1977_v4 = vld [vmem:[#allocation3 + $0x8] sm:$0xff]  ;;  %v1979_v5 = vld [vmem:[#allocation3 + $0x10] sm:$0xff] }
   0xe   :  { %1099 = vperm.xlu0 %1781, %v143_v1   ;;  %1109 = vperm.xlu1 %1782, %v145_v2   ;;  %v1981_v6 = vld [vmem:[#allocation3 + $0x18] sm:$0xff]  ;;  %v881_v7 = vand.u32 2147483647, %v1975_v3  ;;  %v882_v8 = vand.u32 2147483647, %v1977_v4  ;;  %v144_v14 = vld [vmem:[%s2760_s0 + $0x8] sm:$0xff] }
   0xf   :  { %2778 = vst [vmem:[#allocation12_spill] sm:$0xff] %v1981_v6  ;;  %v883_v9 = vand.u32 2147483647, %v1979_v5  ;;  %v884_v10 = vand.u32 2147483647, %v1981_v6  ;;  %v2002_v25 = vld [vmem:[#allocation3 + $0x40] sm:$0xff] }
  0x10   :  { %v893_v11 = vsub.f32 0.0, %v881_v7  ;;  %v894_v12 = vsub.f32 0.0, %v882_v8  ;;  %v2004_v26 = vld [vmem:[#allocation3 + $0x48] sm:$0xff]  ;;  %v889_v33 = vand.u32 2147483647, %v2002_v25  ;;  %v2023_v36 = vld [vmem:[#allocation3 + $0x50] sm:$0xff] }
  0x11   :  { %v895_v13 = vsub.f32 0.0, %v883_v9  ;;  %v896_v15 = vsub.f32 0.0, %v884_v10  ;;  %v890_v34 = vand.u32 2147483647, %v2004_v26  ;;  %v2025_v37 = vld [vmem:[#allocation3 + $0x58] sm:$0xff]  ;;  %vm1364_vm6 = vcmp.ge.f32.partialorder %v1975_v3, 0.0 }
  0x12   :  { %v905_v16 = vmul.f32 1.442695, %v893_v11  ;;  %v907_v17 = vmul.f32 1.442695, %v894_v12  ;;  %v891_v44 = vand.u32 2147483647, %v2023_v36 }
  0x13   :  { %v909_v18 = vmul.f32 1.442695, %v895_v13  ;;  %v911_v19 = vmul.f32 1.442695, %v896_v15  ;;  %v892_v45 = vand.u32 2147483647, %v2025_v37 }
  0x14   :  { %1783 = vpow2.f32 %v905_v16  ;;  %v901_v46 = vsub.f32 0.0, %v889_v33  ;;  %v902_v47 = vsub.f32 0.0, %v890_v34  ;;  %v903_v55 = vsub.f32 0.0, %v891_v44  ;;  %s1942_s0 = smov [#allocation8]  }
  0x15   :  { %1785 = vpow2.f32 %v907_v17  ;;  %v904_v56 = vsub.f32 0.0, %v892_v45  ;;  %vm1365_vm8 = vcmp.ge.f32.partialorder %v1977_v4, 0.0  ;;  %v2100_v45 = vld [vmem:[#allocation6 + $0x8] sm:$0xff]  ;;  %s1758_s28 = sshll.u32 %s1942_s0, 4  ;;  %s1759_s28 = int_to_ptr.vmem [resolvable:$true] %s1758_s28 }
  0x16   :  { %1104 = vperm.xlu0 %1781, %v144_v14   ;;  %1787 = vpow2.f32 %v909_v18  ;;  %v921_v59 = vmul.f32 1.442695, %v901_v46  ;;  %v923_v62 = vmul.f32 1.442695, %v902_v47  ;;  %v925_v63 = vmul.f32 1.442695, %v903_v55 }
  0x17   :  { %1789 = vpow2.f32 %v911_v19  ;;  %v927_v9 = vmul.f32 1.442695, %v904_v56 }
  0x1a   :  { %v1990_v20 = vpop.eup %1783 }
  0x1b   :  { %v1992_v21 = vpop.eup %1785  ;;  %v1995_v22 = vadd.f32 1.0, %v1990_v20 }
  0x1c   :  { %v1997_v23 = vpop.eup %1787  ;;  %v2000_v24 = vadd.f32 1.0, %v1992_v21 }
  0x1d   :  { %v2006_v27 = vpop.eup %1789  ;;  %v2009_v28 = vadd.f32 1.0, %v1997_v23  ;;  %1791 = vrcp.f32 %v1995_v22  ;;  %v1193_v30 = vand.u32 2147483647, %v1995_v22  ;;  %v1195_v31 = vand.u32 2147483648, %v1995_v22 }
  0x1e   :  { %v2013_v29 = vadd.f32 1.0, %v2006_v27  ;;  %1793 = vrcp.f32 %v2000_v24  ;;  %v1208_v32 = vand.u32 2147483647, %v2000_v24  ;;  %v1210_v35 = vand.u32 2147483648, %v2000_v24 }
  0x1f   :  { %1795 = vrcp.f32 %v2009_v28  ;;  %vm1189_vm0 = vweird.f32 %v1995_v22  ;;  %vm1204_vm1 = vweird.f32 %v2000_v24  ;;  %vm2030_vm2 = vcmp.eq.f32.partialorder %v1193_v30, 8.507059e+37 }
  0x20   :  { %1797 = vrcp.f32 %v2013_v29  ;;  %v1196_v39 = vor.u32 1.1754944e-38, %v1195_v31  ;;  %vm1219_vm3 = vweird.f32 %v2009_v28  ;;  %v1223_v40 = vand.u32 2147483647, %v2009_v28 }
  0x21   :  { %v1225_v41 = vand.u32 2147483648, %v2009_v28  ;;  %vm2037_vm4 = vcmp.eq.f32.partialorder %v1208_v32, 8.507059e+37  ;;  %v1211_v50 = vor.u32 1.1754944e-38, %v1210_v35  ;;  %vm1234_vm5 = vweird.f32 %v2013_v29 }
  0x22   :  { %v1238_v51 = vand.u32 2147483647, %v2013_v29  ;;  %v1240_v54 = vand.u32 2147483648, %v2013_v29  ;;  %1799 = vpow2.f32 %v921_v59  ;;  %vm2070_vm15 = vcmp.eq.f32.partialorder %v1223_v40, 8.507059e+37  ;;  %v2091_v40 = vld [vmem:[#allocation6] sm:$0xff]  ;;  %v2136_v59 = vld [vmem:[#allocation6 + $0x18] sm:$0xff] }
  0x23   :  { %v1792_v42 = vpop.eup %1791  ;;  %1801 = vpow2.f32 %v923_v62  ;;  %v1226_v17 = vor.u32 1.1754944e-38, %v1225_v41 }
  0x24   :  { %v1794_v48 = vpop.eup %1793  ;;  %v1185_v49 = vmul.f32 %v1792_v42, %v1995_v22  ;;  %vm1190_vm7 = vweird.f32 %v1792_v42  ;;  %1803 = vpow2.f32 %v925_v63  ;;  %v1241_v35 = vor.u32 1.1754944e-38, %v1240_v54 }
  0x25   :  { %v1796_v52 = vpop.eup %1795  ;;  %v1200_v53 = vmul.f32 %v1794_v48, %v2000_v24  ;;  %vm1205_vm9 = vweird.f32 %v1794_v48  ;;  %vm2054_vm11 = vmor %vm1189_vm0, %vm1190_vm7  ;;  %1805 = vpow2.f32 %v927_v9  ;;  %v2160_v9 = vld [vmem:[#allocation3 + $0x28] sm:$0xff] }
  0x26   :  { %v1186_v57 = vsub.f32 1.0, %v1185_v49  ;;  %v1215_v58 = vmul.f32 %v1796_v52, %v2009_v28  ;;  %v1798_v60 = vpop.eup %1797  ;;  %vm1220_vm10 = vweird.f32 %v1796_v52  ;;  %vm2060_vm13 = vmor %vm1204_vm1, %vm1205_vm9  ;;  %vm2087_vm1 = vcmp.eq.f32.partialorder %v1238_v51, 8.507059e+37 }
  0x27   :  { %v1201_v61 = vsub.f32 1.0, %v1200_v53  ;;  %v1230_v2 = vmul.f32 %v1798_v60, %v2013_v29  ;;  %vm1235_vm12 = vweird.f32 %v1798_v60  ;;  %vm2066_vm14 = vmor %vm1219_vm3, %vm1220_vm10  ;;  %vm1367_vm3 = vcmp.ge.f32.partialorder %v1981_v6, 0.0 }
  0x28   :  { %v1187_v0 = vmul.f32 %v1792_v42, %v1186_v57  ;;  %v1216_v1 = vsub.f32 1.0, %v1215_v58  ;;  %vm2083_vm0 = vmor %vm1234_vm5, %vm1235_vm12  ;;  %v2098_v44 = vpop.eup %1799  ;;  %vm1372_vm10 = vcmp.ge.f32.partialorder %v2002_v25, 0.0  ;;  %vm1373_vm12 = vcmp.ge.f32.partialorder %v2004_v26, 0.0  ;;  %v2271_v25 = vld [vmem:[#allocation6 + $0x50] sm:$0xff] }
  0x29   :  { %v1202_v8 = vmul.f32 %v1794_v48, %v1201_v61  ;;  %v1231_v13 = vsub.f32 1.0, %v1230_v2  ;;  %v2107_v47 = vpop.eup %1801 }
  0x2a   :  { %v1188_v10 = vadd.f32 %v1792_v42, %v1187_v0  ;;  %v1217_v12 = vmul.f32 %v1796_v52, %v1216_v1  ;;  %2795 = vst [vmem:[#allocation13_spill] sm:$0xff] %v2107_v47  ;;  %v2121_v53 = vpop.eup %1803  ;;  %v2132_v57 = vadd.f32 1.0, %v2107_v47 }
  0x2b   :  { %v1203_v14 = vadd.f32 %v1794_v48, %v1202_v8  ;;  %v1232_v30 = vmul.f32 %v1798_v60, %v1231_v13  ;;  %2797 = vst [vmem:[#allocation15_spill] sm:$0xff] %v2121_v53  ;;  %v2134_v58 = vpop.eup %1805  ;;  %v2148_v0 = vadd.f32 1.0, %v2121_v53  ;;  %v2158_v8 = vld [vmem:[#allocation3 + $0x20] sm:$0xff] }
  0x2c   :  { %v1192_v18 = vsel %vm2054_vm11, %v1792_v42, %v1188_v10  ;;  %v1218_v19 = vadd.f32 %v1796_v52, %v1217_v12  ;;  %2798 = vst [vmem:[#allocation16_spill] sm:$0xff] %v2132_v57  ;;  %v2156_v7 = vadd.f32 1.0, %v2134_v58  ;;  %v2162_v10 = vld [vmem:[#allocation3 + $0x30] sm:$0xff]  ;;  %v1328_v16 = vand.u32 2147483647, %v2132_v57 }
  0x2d   :  { %v1197_v31 = vsel %vm2030_vm2, %v1196_v39, %v1192_v18  ;;  %v1207_v32 = vsel %vm2060_vm13, %v1794_v48, %v1203_v14  ;;  %v1233_v41 = vadd.f32 %v1798_v60, %v1232_v30  ;;  %vm1366_vm2 = vcmp.ge.f32.partialorder %v1979_v5, 0.0  ;;  %v2109_v48 = vld [vmem:[#allocation6 + $0x10] sm:$0xff]  ;;  %2799 = vst [vmem:[#allocation17_spill] sm:$0xff] %v2134_v58  ;;  %v2172_v18 = vld [vmem:[#allocation3 + $0x38] sm:$0xff] }
  0x2e   :  { %v1212_v38 = vsel %vm2037_vm4, %v1211_v50, %v1207_v32  ;;  %v1222_v39 = vsel %vm2066_vm14, %v1796_v52, %v1218_v19  ;;  %v1376_v42 = vmul.f32 %v1990_v20, %v1197_v31  ;;  %v2119_v52 = vadd.f32 1.0, %v2098_v44  ;;  %2800 = vst [vmem:[#allocation18_spill] sm:$0xff] %v2148_v0 }
  0x2f   :  { %v1227_v46 = vsel %vm2070_vm15, %v1226_v17, %v1222_v39  ;;  %v1377_v43 = vmul.f32 %v1992_v21, %v1212_v38  ;;  %v1237_v49 = vsel %vm2083_vm0, %v1798_v60, %v1233_v41  ;;  %2801 = vst [vmem:[#allocation19_spill] sm:$0xff] %v2156_v7  ;;  %v1330_v17 = vand.u32 2147483648, %v2132_v57 }
  0x30   :  { %v1378_v50 = vmul.f32 %v1997_v23, %v1227_v46  ;;  %v2116_v51 = vsel %vm1364_vm6, %v1197_v31, %v1376_v42  ;;  %2796 = vst [vmem:[#allocation14_spill] sm:$0xff] %v2119_v52  ;;  %v1242_v54 = vsel %vm2087_vm1, %v1241_v35, %v1237_v49  ;;  %1807 = vrcp.f32 %v2119_v52 }
  0x31   :  { %v2127_v55 = vsel %vm1365_vm8, %v1212_v38, %v1377_v43  ;;  %v1400_v56 = vmul.f32 %v2116_v51, %v2091_v40  ;;  %v1379_v60 = vmul.f32 %v2006_v27, %v1242_v54  ;;  %v1313_v12 = vand.u32 2147483647, %v2119_v52 }
  0x32   :  { %v2141_v61 = vsel %vm1366_vm2, %v1227_v46, %v1378_v50  ;;  %v1401_v62 = vmul.f32 %v2127_v55, %v2100_v45  ;;  %v1315_v13 = vand.u32 2147483648, %v2119_v52  ;;  %1809 = vrcp.f32 %v2132_v57 }
  0x33   :  { %v1402_v63 = vmul.f32 %v2141_v61, %v2109_v48  ;;  %v2153_v1 = vsel %vm1367_vm3, %v1242_v54, %v1379_v60  ;;  %1811 = vrcp.f32 %v2148_v0  ;;  %v885_v19 = vand.u32 2147483647, %v2158_v8 }
  0x34   :  { %v1661_v2 = vadd.f32 %v1401_v62, %v1400_v56  ;;  %v1403_v11 = vmul.f32 %v2153_v1, %v2136_v59  ;;  %v886_v30 = vand.u32 2147483647, %v2160_v9  ;;  %v887_v31 = vand.u32 2147483647, %v2162_v10 }
  0x35   :  { %vm1309_vm4 = vweird.f32 %v2119_v52  ;;  %vm1324_vm5 = vweird.f32 %v2132_v57  ;;  %1813 = vrcp.f32 %v2156_v7  ;;  %vm2181_vm6 = vcmp.eq.f32.partialorder %v1313_v12, 8.507059e+37 }
  0x36   :  { %v1662_v15 = vadd.f32 %v1661_v2, %v1402_v63  ;;  %v1808_v33 = vpop.eup %1807  ;;  %v1316_v35 = vor.u32 1.1754944e-38, %v1315_v13  ;;  %vm1339_vm7 = vweird.f32 %v2148_v0  ;;  %v1343_v38 = vand.u32 2147483647, %v2148_v0 }
  0x37   :  { %v1305_v39 = vmul.f32 %v1808_v33, %v2119_v52  ;;  %vm2188_vm8 = vcmp.eq.f32.partialorder %v1328_v16, 8.507059e+37  ;;  %v1331_v42 = vor.u32 1.1754944e-38, %v1330_v17  ;;  %v1345_v46 = vand.u32 2147483648, %v2148_v0 }
  0x38   :  { %v1663_v32 = vadd.f32 %v1662_v15, %v1403_v11  ;;  %v888_v43 = vand.u32 2147483647, %v2172_v18  ;;  %v1810_v49 = vpop.eup %1809  ;;  %vm1354_vm9 = vweird.f32 %v2156_v7  ;;  %v1358_v50 = vand.u32 2147483647, %v2156_v7 }
  0x39   :  { %v897_v54 = vsub.f32 0.0, %v885_v19  ;;  %v898_v56 = vsub.f32 0.0, %v886_v30  ;;  %v1306_v60 = vsub.f32 1.0, %v1305_v39  ;;  %vm1310_vm11 = vweird.f32 %v1808_v33  ;;  %v1812_v2 = vpop.eup %1811 }
  0x3a   :  { %1664 = vadd.xlane.f32.xlu2 %v1663_v32  ;;  %v1320_v62 = vmul.f32 %v1810_v49, %v2132_v57  ;;  %v899_v63 = vsub.f32 0.0, %v887_v31  ;;  %v1360_v11 = vand.u32 2147483648, %v2156_v7  ;;  %v900_v12 = vsub.f32 0.0, %v888_v43  ;;  %vm2203_vm14 = vmor %vm1309_vm4, %vm1310_vm11 }
  0x3b   :  { %v913_v13 = vmul.f32 1.442695, %v897_v54  ;;  %v915_v15 = vmul.f32 1.442695, %v898_v56  ;;  %v1814_v16 = vpop.eup %1813  ;;  %v1307_v17 = vmul.f32 %v1808_v33, %v1306_v60  ;;  %vm1325_vm13 = vweird.f32 %v1810_v49 }
  0x3c   :  { %v1321_v32 = vsub.f32 1.0, %v1320_v62  ;;  %v1335_v19 = vmul.f32 %v1812_v2, %v2148_v0  ;;  %vm1340_vm15 = vweird.f32 %v1812_v2  ;;  %v1350_v31 = vmul.f32 %v1814_v16, %v2156_v7  ;;  %vm2210_vm0 = vmor %vm1324_vm5, %vm1325_vm13 }
  0x3d   :  { %1815 = vpow2.f32 %v913_v13  ;;  %v917_v39 = vmul.f32 1.442695, %v899_v63  ;;  %v1308_v43 = vadd.f32 %v1808_v33, %v1307_v17  ;;  %vm1355_vm1 = vweird.f32 %v1814_v16  ;;  %vm2225_vm3 = vmor %vm1339_vm7, %vm1340_vm15 }
  0x3e   :  { %v1322_v54 = vmul.f32 %v1810_v49, %v1321_v32  ;;  %v1336_v56 = vsub.f32 1.0, %v1335_v19  ;;  %1817 = vpow2.f32 %v915_v15  ;;  %v1351_v62 = vsub.f32 1.0, %v1350_v31  ;;  %vm2236_vm4 = vmor %vm1354_vm9, %vm1355_vm1 }
  0x3f   :  { %1819 = vpow2.f32 %v917_v39  ;;  %v919_v14 = vmul.f32 1.442695, %v900_v12  ;;  %v1312_v52 = vsel %vm2203_vm14, %v1808_v33, %v1308_v43  ;;  %vm2216_vm2 = vcmp.eq.f32.partialorder %v1343_v38, 8.507059e+37  ;;  %v2229_v33 = vld [vmem:[#allocation6 + $0x40] sm:$0xff] }
  0x40   :  { %v1323_v6 = vadd.f32 %v1810_v49, %v1322_v54  ;;  %v1337_v13 = vmul.f32 %v1812_v2, %v1336_v56  ;;  %v1317_v15 = vsel %vm2181_vm6, %v1316_v35, %v1312_v52  ;;  %v1346_v12 = vor.u32 1.1754944e-38, %v1345_v46 }
  0x41   :  { %v1352_v32 = vmul.f32 %v1814_v16, %v1351_v62  ;;  %1821 = vpow2.f32 %v919_v14  ;;  %v1361_v34 = vor.u32 1.1754944e-38, %v1360_v11  ;;  %v1384_v35 = vmul.f32 %v2098_v44, %v1317_v15 }
  0x42   :  { %v1327_v38 = vsel %vm2210_vm0, %v1810_v49, %v1323_v6  ;;  %v1338_v19 = vadd.f32 %v1812_v2, %v1337_v13  ;;  %vm1359_vm5 = vcmp.eq.f32.partialorder %v1358_v50, 8.507059e+37  ;;  %vm1374_vm6 = vcmp.ge.f32.partialorder %v2023_v36, 0.0  ;;  %v2248_v49 = vld [vmem:[#allocation6 + $0x48] sm:$0xff] }
  0x43   :  { %v2241_v30 = vpop.eup %1815  ;;  %v1332_v14 = vsel %vm2188_vm8, %v1331_v42, %v1327_v38  ;;  %v1353_v46 = vadd.f32 %v1814_v16, %v1352_v32  ;;  %v2255_v39 = vsel %vm1372_vm10, %v1317_v15, %v1384_v35  ;;  %vm1375_vm7 = vcmp.ge.f32.partialorder %v2025_v37, 0.0 }
  0x44   :  { %v2246_v6 = vpop.eup %1817  ;;  %v1342_v31 = vsel %vm2225_vm3, %v1812_v2, %v1338_v19  ;;  %v1385_v11 = vmul.f32 %v2107_v47, %v1332_v14  ;;  %v2258_v41 = vadd.f32 1.0, %v2241_v30  ;;  %v1408_v2 = vmul.f32 %v2255_v39, %v2229_v33 }
  0x45   :  { %v2260_v42 = vpop.eup %1819  ;;  %v1347_v50 = vsel %vm2216_vm2, %v1346_v12, %v1342_v31  ;;  %v1357_v43 = vsel %vm2236_vm4, %v1814_v16, %v1353_v46  ;;  %v2269_v54 = vadd.f32 1.0, %v2246_v6  ;;  %v2281_v16 = vld [vmem:[#allocation6 + $0x58] sm:$0xff]  ;;  %v2307_v36 = vmul.f32 %v2136_v59, %v2136_v59 }
  0x46   :  { %v1362_v56 = vsel %vm1359_vm5, %v1361_v34, %v1357_v43  ;;  %v1386_v60 = vmul.f32 %v2121_v53, %v1347_v50  ;;  %v2277_v62 = vsel %vm1373_vm12, %v1332_v14, %v1385_v11  ;;  %2816 = vst [vmem:[#allocation20_spill] sm:$0xff] %v2281_v16  ;;  %v2287_v17 = vadd.f32 1.0, %v2260_v42 }
  0x47   :  { %v2279_v13 = vpop.eup %1821  ;;  %v1387_v63 = vmul.f32 %v2134_v58, %v1362_v56  ;;  %v1409_v15 = vmul.f32 %v2277_v62, %v2248_v49  ;;  %1823 = vrcp.f32 %v2258_v41  ;;  %v1253_v12 = vand.u32 2147483647, %v2258_v41  ;;  %2817 = vst [vmem:[#allocation21_spill] sm:$0xff] %v2307_v36 }
  0x48   :  { %v2292_v37 = vsel %vm1374_vm6, %v1347_v50, %v1386_v60  ;;  %v2295_v26 = vadd.f32 1.0, %v2279_v13  ;;  %v1255_v32 = vand.u32 2147483648, %v2258_v41  ;;  %1825 = vrcp.f32 %v2269_v54 }
  0x49   :  { %v2299_v38 = vsel %vm1375_vm7, %v1362_v56, %v1387_v63  ;;  %v1410_v19 = vmul.f32 %v2292_v37, %v2271_v25  ;;  %v1671_v52 = vadd.f32 %v1409_v15, %v1408_v2  ;;  %vm1249_vm8 = vweird.f32 %v2258_v41 }
  0x4a   :  { %v1411_v35 = vmul.f32 %v2299_v38, %v2281_v16  ;;  %v1268_v46 = vand.u32 2147483647, %v2269_v54  ;;  %v1270_v31 = vand.u32 2147483648, %v2269_v54  ;;  %1827 = vrcp.f32 %v2287_v17 }
  0x4b   :  { %v1672_v14 = vadd.f32 %v1671_v52, %v1410_v19  ;;  %vm2315_vm9 = vcmp.eq.f32.partialorder %v1253_v12, 8.507059e+37  ;;  %v1256_v50 = vor.u32 1.1754944e-38, %v1255_v32  ;;  %v1283_v43 = vand.u32 2147483647, %v2287_v17 }
  0x4c   :  { %1829 = vrcp.f32 %v2295_v26  ;;  %vm1264_vm10 = vweird.f32 %v2269_v54  ;;  %vm1279_vm11 = vweird.f32 %v2287_v17  ;;  %v1285_v60 = vand.u32 2147483648, %v2287_v17 }
  0x4d   :  { %v1824_v2 = vpop.eup %1823  ;;  %v1673_v56 = vadd.f32 %v1672_v14, %v1411_v35  ;;  %vm2325_vm13 = vcmp.eq.f32.partialorder %v1268_v46, 8.507059e+37  ;;  %v1271_v12 = vor.u32 1.1754944e-38, %v1270_v31  ;;  %vm1294_vm14 = vweird.f32 %v2295_v26  ;;  %v2428_v31 = vld [vmem:[#allocation6 + $0x38] sm:$0xff] }
  0x4e   :  { %v1245_v63 = vmul.f32 %v1824_v2, %v2258_v41  ;;  %vm1250_vm12 = vweird.f32 %v1824_v2  ;;  %v1826_v32 = vpop.eup %1825  ;;  %v1298_v19 = vand.u32 2147483647, %v2295_v26  ;;  %v1300_v52 = vand.u32 2147483648, %v2295_v26 }
  0x4f   :  { %1674 = vadd.xlane.f32.xlu2 %v1673_v56  ;;  %vm1368_vm15 = vcmp.ge.f32.partialorder %v2158_v8, 0.0  ;;  %v1412_v35 = vmul.f32 %v2116_v51, %v2116_v51  ;;  %v1413_v14 = vmul.f32 %v2127_v55, %v2127_v55  ;;  %v1260_v34 = vmul.f32 %v1826_v32, %v2269_v54  ;;  %vm2355_vm4 = vmor %vm1249_vm8, %vm1250_vm12 }
  0x50   :  { %v1246_v46 = vsub.f32 1.0, %v1245_v63  ;;  %vm2338_vm0 = vcmp.eq.f32.partialorder %v1283_v43, 8.507059e+37  ;;  %v1414_v56 = vmul.f32 %v2141_v61, %v2141_v61  ;;  %v1828_v58 = vpop.eup %1827  ;;  %vm1265_vm1 = vweird.f32 %v1826_v32  ;;  %v2387_v61 = vld [vmem:[#allocation6 + $0x20] sm:$0xff] }
  0x51   :  { %v1286_v7 = vor.u32 1.1754944e-38, %v1285_v60  ;;  %v1415_v51 = vmul.f32 %v2153_v1, %v2153_v1  ;;  %v1676_v53 = vadd.f32 %v1413_v14, %v1412_v35  ;;  %v1261_v0 = vsub.f32 1.0, %v1260_v34  ;;  %vm2365_vm8 = vmor %vm1264_vm10, %vm1265_vm1 }
  0x52   :  { %v1830_v55 = vpop.eup %1829  ;;  %v1247_v63 = vmul.f32 %v1824_v2, %v1246_v46  ;;  %v1275_v43 = vmul.f32 %v1828_v58, %v2287_v17  ;;  %vm2348_vm3 = vcmp.eq.f32.partialorder %v1298_v19, 8.507059e+37  ;;  %vm1280_vm5 = vweird.f32 %v1828_v58 }
  0x53   :  { %v1290_v1 = vmul.f32 %v1830_v55, %v2295_v26  ;;  %v1301_v60 = vor.u32 1.1754944e-38, %v1300_v52  ;;  %vm1370_vm6 = vcmp.ge.f32.partialorder %v2162_v10, 0.0  ;;  %v1677_v34 = vadd.f32 %v1676_v53, %v1414_v56  ;;  %vm2381_vm10 = vmor %vm1279_vm11, %vm1280_vm5 }
  0x54   :  { %v1248_v35 = vadd.f32 %v1824_v2, %v1247_v63  ;;  %v1262_v14 = vmul.f32 %v1826_v32, %v1261_v0  ;;  %v1276_v19 = vsub.f32 1.0, %v1275_v43  ;;  %vm1295_vm7 = vweird.f32 %v1830_v55 }
  0x55   :  { %vm1371_vm2 = vcmp.ge.f32.partialorder %v2172_v18, 0.0  ;;  %v1291_v36 = vsub.f32 1.0, %v1290_v1  ;;  %v1678_v57 = vadd.f32 %v1677_v34, %v1415_v51  ;;  %v1420_v52 = vmul.f32 %v2255_v39, %v2255_v39  ;;  %v2404_v34 = vld [vmem:[#allocation6 + $0x28] sm:$0xff] }
  0x56   :  { %v1421_v53 = vmul.f32 %v2277_v62, %v2277_v62  ;;  %v1252_v0 = vsel %vm2355_vm4, %v1824_v2, %v1248_v35  ;;  %v1263_v56 = vadd.f32 %v1826_v32, %v1262_v14  ;;  %v1277_v63 = vmul.f32 %v1828_v58, %v1276_v19 }
  0x57   :  { %1831 = vlog2.f32 %v1995_v22  ;;  %v1257_v43 = vsel %vm2315_vm9, %v1256_v50, %v1252_v0  ;;  %v1292_v39 = vmul.f32 %v1830_v55, %v1291_v36  ;;  %1679 = vadd.xlane.f32.xlu2 %v1678_v57  ;;  %v1422_v62 = vmul.f32 %v2292_v37, %v2292_v37  ;;  %vm2394_vm9 = vmor %vm1294_vm14, %vm1295_vm7 }
  0x58   :  { %v1686_v2 = vadd.f32 %v1421_v53, %v1420_v52  ;;  %v1267_v22 = vsel %vm2365_vm8, %v1826_v32, %v1263_v56  ;;  %v1278_v11 = vadd.f32 %v1828_v58, %v1277_v63  ;;  %v1380_v36 = vmul.f32 %v2241_v30, %v1257_v43  ;;  %v2417_v53 = vld [vmem:[#allocation6 + $0x30] sm:$0xff] }
  0x59   :  { %1833 = vlog2.f32 %v2000_v24  ;;  %v1272_v57 = vsel %vm2325_vm13, %v1271_v12, %v1267_v22  ;;  %v1293_v37 = vadd.f32 %v1830_v55, %v1292_v39  ;;  %v1423_v1 = vmul.f32 %v2299_v38, %v2299_v38 }
  0x5a   :  { %v1687_v32 = vadd.f32 %v1686_v2, %v1422_v62  ;;  %v1282_v35 = vsel %vm2381_vm10, %v1828_v58, %v1278_v11  ;;  %v1381_v14 = vmul.f32 %v2246_v6, %v1272_v57  ;;  %v1392_v19 = vsel %vm1368_vm15, %v1257_v43, %v1380_v36 }
  0x5b   :  { %v932_v24 = vmul.f32 -0.5, %v1990_v20  ;;  %v1287_v15 = vsel %vm2338_vm0, %v1286_v7, %v1282_v35  ;;  %v1297_v12 = vsel %vm2394_vm9, %v1830_v55, %v1293_v37  ;;  %v1404_v38 = vmul.f32 %v1392_v19, %v2387_v61 }
  0x5c   :  { %v1416_v46 = vmul.f32 %v1392_v19, %v1392_v19  ;;  %v1302_v58 = vsel %vm2348_vm3, %v1301_v60, %v1297_v12  ;;  %v1382_v0 = vmul.f32 %v2260_v42, %v1287_v15  ;;  %vm2834_vm11 = vcmp.ge.f32.partialorder %v2160_v9, 0.0 }
  0x5d   :  { %v1832_v52 = vpop.eup %1831  ;;  %v1393_v56 = vsel %vm2834_vm11, %v1272_v57, %v1381_v14  ;;  %v2426_v7 = vmul.f32 %v2091_v40, %v2091_v40  ;;  %v1383_v55 = vmul.f32 %v2279_v13, %v1302_v58  ;;  %v2438_v62 = vmul.f32 %v2100_v45, %v2100_v45 }
  0x5e   :  { %v1405_v63 = vmul.f32 %v1393_v56, %v2404_v34  ;;  %v1417_v43 = vmul.f32 %v1393_v56, %v1393_v56  ;;  %v1394_v60 = vsel %vm1370_vm6, %v1287_v15, %v1382_v0  ;;  %v2442_v2 = vmul.f32 %v2109_v48, %v2109_v48 }
  0x5f   :  { %v1834_v47 = vpop.eup %1833  ;;  %v1395_v22 = vsel %vm1371_vm2, %v1302_v58, %v1383_v55  ;;  %v1406_v11 = vmul.f32 %v1394_v60, %v2417_v53  ;;  %v1418_v36 = vmul.f32 %v1394_v60, %v1394_v60  ;;  %v1688_v14 = vadd.f32 %v1687_v32, %v1423_v1 }
  0x60   :  { %v1666_v50 = vadd.f32 %v1405_v63, %v1404_v38  ;;  %v1407_v57 = vmul.f32 %v1395_v22, %v2428_v31  ;;  %v1419_v37 = vmul.f32 %v1395_v22, %v1395_v22  ;;  %v1681_v35 = vadd.f32 %v1417_v43, %v1416_v46 }
  0x61   :  { %v931_v15 = vmul.f32 0.6931472, %v1832_v52  ;;  %v933_v12 = vadd.f32 1.0, %v932_v24  ;;  %v935_v0 = vand.u32 2147483647, %v1990_v20  ;;  %v941_v51 = vmul.f32 -0.5, %v1992_v21 }
  0x62   :  { %v1667_v19 = vadd.f32 %v1666_v50, %v1406_v11  ;;  %v1682_v56 = vadd.f32 %v1681_v35, %v1418_v36  ;;  %v940_v39 = vmul.f32 0.6931472, %v1834_v47  ;;  %v944_v58 = vand.u32 2147483647, %v1992_v21 }
  0x63   :  { %v934_v38 = vmul.f32 %v1990_v20, %v933_v12  ;;  %vm2452_vm12 = vcmp.lt.f32.partialorder %v935_v0, 0.0004427343  ;;  %1835 = vlog2.f32 %v2009_v28  ;;  %v2459_v32 = vmul.f32 %v2387_v61, %v2387_v61 }
  0x64   :  { %v1668_v55 = vadd.f32 %v1667_v19, %v1407_v57  ;;  %v1683_v1 = vadd.f32 %v1682_v56, %v1419_v37  ;;  %v2463_v24 = vmul.f32 %v2404_v34, %v2404_v34  ;;  %v2467_v46 = vmul.f32 %v2417_v53, %v2417_v53 }
  0x65   :  { %v2474_v43 = vmul.f32 %v2428_v31, %v2428_v31  ;;  %v937_v47 = vsel %vm2452_vm12, %v934_v38, %v931_v15  ;;  %v942_v60 = vadd.f32 1.0, %v941_v51  ;;  %vm2478_vm13 = vcmp.lt.f32.partialorder %v944_v58, 0.0004427343 }
  0x66   :  { %1669 = vadd.xlane.f32.xlu0 %v1668_v55  ;;  %1684 = vadd.xlane.f32.xlu2 %v1683_v1  ;;  %v950_v11 = vmul.f32 -0.5, %v1997_v23  ;;  %v953_v50 = vand.u32 2147483647, %v1997_v23  ;;  %1837 = vlog2.f32 %v2013_v29  ;;  %v959_v36 = vmul.f32 -0.5, %v2006_v27 }
  0x67   :  { %v962_v57 = vand.u32 2147483647, %v2006_v27  ;;  %v2492_v19 = vmul.f32 %v2229_v33, %v2229_v33  ;;  %v2496_v12 = vmul.f32 %v2248_v49, %v2248_v49  ;;  %v2500_v29 = vmul.f32 %v2271_v25, %v2271_v25 }
  0x68   :  { %v2504_v0 = vmul.f32 %v2281_v16, %v2281_v16  ;;  %v943_v56 = vmul.f32 %v1992_v21, %v942_v60  ;;  %v951_v55 = vadd.f32 1.0, %v950_v11  ;;  %vm2507_vm14 = vcmp.lt.f32.partialorder %v953_v50, 0.0004427343  ;;  %v2843_v50 = vld [vmem:[#allocation12_spill] sm:$0xff] }
  0x69   :  { %v1836_v15 = vpop.eup %1835  ;;  %v960_v63 = vadd.f32 1.0, %v959_v36  ;;  %vm2513_vm15 = vcmp.lt.f32.partialorder %v962_v57, 0.0004427343  ;;  %v1037_v35 = vsub.f32 0.0, %v1975_v3  ;;  %v1038_v37 = vsub.f32 0.0, %v1977_v4 }
  0x6a   :  { %v949_v58 = vmul.f32 0.6931472, %v1836_v15  ;;  %v946_v1 = vsel %vm2478_vm13, %v943_v56, %v940_v39  ;;  %v952_v21 = vmul.f32 %v1997_v23, %v951_v55  ;;  %v1039_v11 = vsub.f32 0.0, %v1979_v5 }
  0x6b   :  { %v961_v60 = vmul.f32 %v2006_v27, %v960_v63  ;;  %v1040_v15 = vsub.f32 0.0, %v2843_v50  ;;  %v1049_v28 = vmax.f32 %v1037_v35, 0.0  ;;  %v1050_v22 = vmax.f32 %v1038_v37, 0.0 }
  0x6c   :  { %v1838_v36 = vpop.eup %1837  ;;  %v2844_v39 = vsub.f32 1.0, %v2091_v40  ;;  %v2845_v56 = vsub.f32 1.0, %v2100_v45  ;;  %v955_v23 = vsel %vm2507_vm14, %v952_v21, %v949_v58  ;;  %v1051_v55 = vmax.f32 %v1039_v11, 0.0 }
  0x6d   :  { %v958_v27 = vmul.f32 0.6931472, %v1838_v36  ;;  %v1052_v63 = vmax.f32 %v1040_v15, 0.0  ;;  %v2535_v20 = vadd.f32 %v1049_v28, %v937_v47  ;;  %v2537_v37 = vadd.f32 %v1050_v22, %v946_v1 }
  0x6e   :  { %v2526_v57 = vmul.f32 %v2844_v39, %v1975_v3  ;;  %v2531_v52 = vmul.f32 %v2845_v56, %v1977_v4  ;;  %1689 = vadd.xlane.f32.xlu2 %v1688_v14  ;;  %v2846_v3 = vsub.f32 1.0, %v2109_v48  ;;  %v2847_v4 = vsub.f32 1.0, %v2136_v59 }
  0x6f   :  { %v964_v14 = vsel %vm2513_vm15, %v961_v60, %v958_v27  ;;  %v2551_v58 = vadd.f32 %v1051_v55, %v955_v23  ;;  %1839 = vlog2.f32 %v2258_v41  ;;  %v968_v28 = vmul.f32 -0.5, %v2241_v30 }
  0x70   :  { %v2542_v35 = vmul.f32 %v2846_v3, %v1979_v5  ;;  %v2547_v39 = vmul.f32 %v2847_v4, %v2843_v50  ;;  %v2555_v47 = vadd.f32 %v1052_v63, %v964_v14  ;;  %v971_v38 = vand.u32 2147483647, %v2241_v30 }
  0x71   :  { %1841 = vlog2.f32 %v2269_v54  ;;  %v977_v5 = vmul.f32 -0.5, %v2246_v6  ;;  %v969_v1 = vadd.f32 1.0, %v968_v28  ;;  %v980_v21 = vand.u32 2147483647, %v2246_v6 }
  0x72   :  { %1843 = vlog2.f32 %v2287_v17  ;;  %v986_v51 = vmul.f32 -0.5, %v2260_v42  ;;  %vm2563_vm0 = vcmp.lt.f32.partialorder %v971_v38, 0.0004427343  ;;  %v989_v11 = vand.u32 2147483647, %v2260_v42 }
  0x73   :  { %v978_v41 = vadd.f32 1.0, %v977_v5  ;;  %1845 = vlog2.f32 %v2295_v26  ;;  %v970_v54 = vmul.f32 %v2241_v30, %v969_v1  ;;  %vm2570_vm1 = vcmp.lt.f32.partialorder %v980_v21, 0.0004427343 }
  0x74   :  { %v987_v15 = vadd.f32 1.0, %v986_v51  ;;  %v995_v17 = vmul.f32 -0.5, %v2279_v13  ;;  %vm2576_vm2 = vcmp.lt.f32.partialorder %v989_v11, 0.0004427343  ;;  %v998_v56 = vand.u32 2147483647, %v2279_v13 }
  0x75   :  { %v979_v36 = vmul.f32 %v2246_v6, %v978_v41  ;;  %v1041_v23 = vsub.f32 0.0, %v2158_v8  ;;  %v1840_v26 = vpop.eup %1839  ;;  %v1042_v55 = vsub.f32 0.0, %v2160_v9  ;;  %v1043_v63 = vsub.f32 0.0, %v2162_v10 }
  0x76   :  { %v988_v30 = vmul.f32 %v2260_v42, %v987_v15  ;;  %v996_v27 = vadd.f32 1.0, %v995_v17  ;;  %v967_v4 = vmul.f32 0.6931472, %v1840_v26  ;;  %vm2585_vm3 = vcmp.lt.f32.partialorder %v998_v56, 0.0004427343 }
  0x77   :  { %v1842_v3 = vpop.eup %1841  ;;  %v1044_v14 = vsub.f32 0.0, %v2172_v18  ;;  %v1053_v28 = vmax.f32 %v1041_v23, 0.0  ;;  %v1054_v21 = vmax.f32 %v1042_v55, 0.0  ;;  %v1055_v42 = vmax.f32 %v1043_v63, 0.0 }
  0x78   :  { %v1844_v38 = vpop.eup %1843  ;;  %v976_v5 = vmul.f32 0.6931472, %v1842_v3  ;;  %v997_v1 = vmul.f32 %v2279_v13, %v996_v27  ;;  %v973_v41 = vsel %vm2563_vm0, %v970_v54, %v967_v4  ;;  %v1080_v17 = vsub.f32 1.0, %v2428_v31  ;;  %v2881_v31 = vld [vmem:[#allocation19_spill] sm:$0xff] }
  0x79   :  { %v1846_v51 = vpop.eup %1845  ;;  %v985_v11 = vmul.f32 0.6931472, %v1844_v38  ;;  %v1056_v15 = vmax.f32 %v1044_v14, 0.0  ;;  %v2596_v16 = vadd.f32 %v1053_v28, %v973_v41  ;;  %v2856_v23 = vsub.f32 1.0, %v2387_v61 }
  0x7a   :  { %v982_v56 = vsel %vm2570_vm1, %v979_v36, %v976_v5  ;;  %v994_v26 = vmul.f32 0.6931472, %v1846_v51  ;;  %v2857_v54 = vsub.f32 1.0, %v2404_v34  ;;  %v2858_v50 = vsub.f32 1.0, %v2417_v53 }
  0x7b   :  { %v2601_v13 = vmul.f32 %v2856_v23, %v2158_v8  ;;  %v991_v27 = vsel %vm2576_vm2, %v988_v30, %v985_v11  ;;  %v2605_v60 = vadd.f32 %v1054_v21, %v982_v56  ;;  %v2622_v22 = vmul.f32 %v1080_v17, %v2172_v18  ;;  %v2859_v30 = vld [vmem:[#allocation14_spill] sm:$0xff] }
  0x7c   :  { %v2610_v55 = vmul.f32 %v2857_v54, %v2160_v9  ;;  %v2615_v36 = vmul.f32 %v2858_v50, %v2162_v10  ;;  %v1000_v63 = vsel %vm2585_vm3, %v997_v1, %v994_v26  ;;  %v1067_v8 = vadd.f32 %v1055_v42, %v991_v27  ;;  %v2860_v10 = vld [vmem:[#allocation16_spill] sm:$0xff]  ;;  %v2861_v1 = vld [vmem:[#allocation21_spill] sm:$0xff] }
  0x7d   :  { %1847 = vlog2.f32 %v2859_v30  ;;  %v1068_v9 = vadd.f32 %v1056_v15, %v1000_v63  ;;  %v1004_v14 = vmul.f32 -0.5, %v2098_v44  ;;  %v1007_v28 = vand.u32 2147483647, %v2098_v44 }
  0x7e   :  { %1849 = vlog2.f32 %v2860_v10  ;;  %v2862_v11 = vsub.f32 1.0, %v2091_v40  ;;  %v2863_v56 = vsub.f32 1.0, %v2100_v45  ;;  %v2864_v23 = vsub.f32 1.0, %v2109_v48 }
  0x7f   :  { %v2865_v54 = vsub.f32 1.0, %v2136_v59  ;;  %v2866_v63 = vsub.f32 1.0, %v2229_v33  ;;  %v2868_v40 = vsub.f32 1.0, %v2271_v25  ;;  %v1005_v45 = vadd.f32 1.0, %v1004_v14  ;;  %v2871_v14 = vld [vmem:[#allocation13_spill] sm:$0xff] }
  0x80   :  { %v1100_v3 = vpop.permute.xlu0 %1099  ;;  %v1110_v4 = vpop.permute.xlu1 %1109  ;;  %vm2667_vm4 = vcmp.lt.f32.partialorder %v1007_v28, 0.0004427343  ;;  %vm1723_vm8 = vcmask 130112   ;;  %vm1727_vm10 = vcmask 195712   ;;  %vm1744_vm9 = vcmask 1041409  }
  0x81   :  { %v1112_v6 = vmul.f32 %v1100_v3, %v2426_v7  ;;  %v1113_v38 = vmul.f32 %v1100_v3, %v2438_v62  ;;  %v1114_v5 = vmul.f32 %v1100_v3, %v2442_v2  ;;  %v1115_v18 = vmul.f32 %v1100_v3, %v2861_v1 }
  0x82   :  { %v1120_v21 = vmul.f32 %v1110_v4, %v2492_v19  ;;  %v1121_v42 = vmul.f32 %v1110_v4, %v2496_v12  ;;  %v1122_v51 = vmul.f32 %v1110_v4, %v2500_v29  ;;  %v2636_v41 = vmul.f32 %v1110_v4, %v2504_v0 }
  0x83   :  { %v1124_v15 = vadd.f32 %v1112_v6, %v2862_v11  ;;  %v1125_v26 = vadd.f32 %v1113_v38, %v2863_v56  ;;  %v1126_v27 = vadd.f32 %v1114_v5, %v2864_v23  ;;  %v1127_v50 = vadd.f32 %v1115_v18, %v2865_v54  ;;  %v1848_v6 = vpop.eup %1847 }
  0x84   :  { %v2648_v30 = vadd.f32 %v1120_v21, %v2866_v63  ;;  %v2867_v3 = vsub.f32 1.0, %v2248_v49  ;;  %v2656_v10 = vadd.f32 %v1122_v51, %v2868_v40  ;;  %v1850_v18 = vpop.eup %1849  ;;  %v2662_v21 = vmul.f32 0.6931472, %v1848_v6 }
  0x85   :  { %v1148_v48 = vmul.f32 %v1124_v15, %v2535_v20  ;;  %v1149_v38 = vmul.f32 %v1125_v26, %v2537_v37  ;;  %v1150_v59 = vmul.f32 %v1126_v27, %v2551_v58  ;;  %v1151_v5 = vmul.f32 %v1127_v50, %v2555_v47  ;;  %v2874_v50 = vld [vmem:[#allocation18_spill] sm:$0xff] }
  0x86   :  { %v2652_v4 = vadd.f32 %v1121_v42, %v2867_v3  ;;  %v2665_v42 = vmul.f32 %v2098_v44, %v1005_v45  ;;  %v1013_v51 = vmul.f32 -0.5, %v2871_v14  ;;  %v1012_v28 = vmul.f32 0.6931472, %v1850_v18  ;;  %v2878_v18 = vld [vmem:[#allocation15_spill] sm:$0xff] }
  0x87   :  { %v1160_v20 = vadd.f32 %v1148_v48, %v2526_v57  ;;  %v1161_v37 = vadd.f32 %v1149_v38, %v2531_v52  ;;  %v1162_v58 = vadd.f32 %v1150_v59, %v2542_v35  ;;  %v1163_v47 = vadd.f32 %v1151_v5, %v2547_v39 }
  0x88   :  { %v1105_v15 = vpop.permute.xlu0 %1104  ;;  %v1009_v44 = vsel %vm2667_vm4, %v2665_v42, %v2662_v21  ;;  %v1014_v56 = vadd.f32 1.0, %v1013_v51  ;;  %v1016_v26 = vand.u32 2147483647, %v2871_v14  ;;  %1851 = vlog2.f32 %v2874_v50 }
  0x89   :  { %v1116_v23 = vmul.f32 %v1105_v15, %v2459_v32  ;;  %v1117_v57 = vmul.f32 %v1105_v15, %v2463_v24  ;;  %v1118_v52 = vmul.f32 %v1105_v15, %v2467_v46  ;;  %v1119_v35 = vmul.f32 %v1105_v15, %v2474_v43 }
  0x8a   :  { %v1646_v27 = vadd.f32 %v1161_v37, %v1160_v20  ;;  %v1015_v39 = vmul.f32 %v2871_v14, %v1014_v56  ;;  %vm2686_vm5 = vcmp.lt.f32.partialorder %v1016_v26, 0.0004427343  ;;  %v2875_v63 = vsub.f32 1.0, %v2387_v61 }
  0x8b   :  { %v2876_v40 = vsub.f32 1.0, %v2404_v34  ;;  %v2877_v6 = vsub.f32 1.0, %v2417_v53  ;;  %v1131_v38 = vadd.f32 %v1119_v35, %v1080_v17  ;;  %v1022_v21 = vmul.f32 -0.5, %v2878_v18 }
  0x8c   :  { %v1128_v3 = vadd.f32 %v1116_v23, %v2875_v63  ;;  %v1647_v59 = vadd.f32 %v1646_v27, %v1162_v58  ;;  %v1018_v5 = vsel %vm2686_vm5, %v1015_v39, %v1012_v28  ;;  %v1025_v42 = vand.u32 2147483647, %v2878_v18  ;;  %v1855_v28 = vld [vmem:[#allocation3 + $0x40] sm:$0xff] }
  0x8d   :  { %v1129_v45 = vadd.f32 %v1117_v57, %v2876_v40  ;;  %v1130_v48 = vadd.f32 %v1118_v52, %v2877_v6  ;;  %v1155_v14 = vmul.f32 %v1131_v38, %v1068_v9  ;;  %v1023_v53 = vadd.f32 1.0, %v1022_v21  ;;  %v1856_v57 = vld [vmem:[#allocation3 + $0x48] sm:$0xff]  ;;  %v1857_v52 = vld [vmem:[#allocation3 + $0x50] sm:$0xff] }
  0x8e   :  { %v1152_v61 = vmul.f32 %v1128_v3, %v2596_v16  ;;  %v1648_v51 = vadd.f32 %v1647_v59, %v1163_v47  ;;  %vm2705_vm6 = vcmp.lt.f32.partialorder %v1025_v42, 0.0004427343  ;;  %1853 = vlog2.f32 %v2881_v31  ;;  %v1852_v15 = vpop.eup %1851  ;;  %v2885_v38 = vld [vmem:[#allocation20_spill] sm:$0xff] }
  0x8f   :  { %v1153_v11 = vmul.f32 %v1129_v45, %v2605_v60  ;;  %v1154_v34 = vmul.f32 %v1130_v48, %v1067_v8  ;;  %v1167_v16 = vadd.f32 %v1155_v14, %v2622_v22  ;;  %v1024_v60 = vmul.f32 %v2878_v18, %v1023_v53  ;;  %v2882_v8 = vld [vmem:[#allocation17_spill] sm:$0xff]  ;;  %v1858_v22 = vld [vmem:[#allocation3 + $0x58] sm:$0xff] }
  0x90   :  { %v1164_v17 = vadd.f32 %v1152_v61, %v2601_v13  ;;  %1649 = vadd.xlane.f32.xlu1 %v1648_v51  ;;  %v1031_v9 = vmul.f32 -0.5, %v2882_v8  ;;  %v1034_v47 = vand.u32 2147483647, %v2882_v8  ;;  %v1045_v56 = vsub.f32 0.0, %v1855_v28 }
  0x91   :  { %v1165_v37 = vadd.f32 %v1153_v11, %v2610_v55  ;;  %v1166_v58 = vadd.f32 %v1154_v34, %v2615_v36  ;;  %v1021_v23 = vmul.f32 0.6931472, %v1852_v15  ;;  %v1046_v13 = vsub.f32 0.0, %v1856_v57 }
  0x92   :  { %v1047_v55 = vsub.f32 0.0, %v1857_v52  ;;  %v1032_v35 = vadd.f32 1.0, %v1031_v9  ;;  %vm2717_vm7 = vcmp.lt.f32.partialorder %v1034_v47, 0.0004427343  ;;  %v1048_v27 = vsub.f32 0.0, %v1858_v22 }
  0x93   :  { %v1651_v26 = vadd.f32 %v1165_v37, %v1164_v17  ;;  %v1057_v39 = vmax.f32 %v1045_v56, 0.0  ;;  %v1027_v50 = vsel %vm2705_vm6, %v1024_v60, %v1021_v23  ;;  %v1058_v63 = vmax.f32 %v1046_v13, 0.0 }
  0x94   :  { %v1059_v3 = vmax.f32 %v1047_v55, 0.0  ;;  %v1854_v40 = vpop.eup %1853  ;;  %v1033_v45 = vmul.f32 %v2882_v8, %v1032_v35  ;;  %v1060_v6 = vmax.f32 %v1048_v27, 0.0  ;;  %v1084_v59 = vsub.f32 1.0, %v2885_v38 }
  0x95   :  { %v1652_v54 = vadd.f32 %v1651_v26, %v1166_v58  ;;  %v1069_v48 = vadd.f32 %v1057_v39, %v1009_v44  ;;  %v1030_v21 = vmul.f32 0.6931472, %v1854_v40  ;;  %v1070_v42 = vadd.f32 %v1058_v63, %v1018_v5 }
  0x96   :  { %v1071_v61 = vadd.f32 %v1059_v3, %v1027_v50  ;;  %v1135_v11 = vadd.f32 %v2636_v41, %v1084_v59  ;;  %v2886_v34 = vsub.f32 1.0, %v2229_v33  ;;  %v2887_v51 = vsub.f32 1.0, %v2248_v49 }
  0x97   :  { %v1653_v18 = vadd.f32 %v1652_v54, %v1167_v16  ;;  %v2888_v20 = vsub.f32 1.0, %v2271_v25  ;;  %v1036_v44 = vsel %vm2717_vm7, %v1033_v45, %v1030_v21  ;;  %v1156_v17 = vmul.f32 %v2648_v30, %v1069_v48 }
  0x98   :  { %v1144_v14 = vmul.f32 %v1855_v28, %v2886_v34  ;;  %v1145_v53 = vmul.f32 %v1856_v57, %v2887_v51  ;;  %v1157_v5 = vmul.f32 %v2652_v4, %v1070_v42  ;;  %v1072_v37 = vadd.f32 %v1060_v6, %v1036_v44 }
  0x99   :  { %v1146_v31 = vmul.f32 %v1857_v52, %v2888_v20  ;;  %1654 = vadd.xlane.f32.xlu2 %v1653_v18  ;;  %v1147_v58 = vmul.f32 %v1858_v22, %v1084_v59  ;;  %v1158_v41 = vmul.f32 %v2656_v10, %v1071_v61  ;;  %v1691_v33 = vadd.f32 %v2438_v62, %v2426_v7 }
  0x9a   :  { %v1168_v49 = vadd.f32 %v1156_v17, %v1144_v14  ;;  %v1169_v16 = vadd.f32 %v1157_v5, %v1145_v53  ;;  %v1701_v25 = vadd.f32 %v2496_v12, %v2492_v19  ;;  %v1159_v15 = vmul.f32 %v1135_v11, %v1072_v37 }
  0x9b   :  { %v1170_v60 = vadd.f32 %v1158_v41, %v1146_v31  ;;  %v1692_v8 = vadd.f32 %v1691_v33, %v2442_v2  ;;  %v1696_v10 = vadd.f32 %v2463_v24, %v2459_v32  ;;  %v1718_v23 = vlaneseq }
  0x9c   :  { %v1656_v9 = vadd.f32 %v1169_v16, %v1168_v49  ;;  %v1702_v30 = vadd.f32 %v1701_v25, %v2500_v29  ;;  %v1171_v4 = vadd.f32 %v1159_v15, %v1147_v58  ;;  %vm1746_vm11 = vcmask 1042434  }
  0x9d   :  { %v1693_v47 = vadd.f32 %v1692_v8, %v2861_v1  ;;  %v1697_v19 = vadd.f32 %v1696_v10, %v2467_v46  ;;  %v1719_v13 = vand.u32 127, %v1718_v23  ;;  %vm1748_vm12 = vcmask 1043459  }
  0x9e   :  { %v1657_v28 = vadd.f32 %v1656_v9, %v1170_v60  ;;  %v1703_v7 = vadd.f32 %v1702_v30, %v2504_v0  ;;  %vm1751_vm13 = vcmask 191488  }
  0x9f   :  { %1694 = vadd.xlane.f32.xlu1 %v1693_v47  ;;  %v1698_v2 = vadd.f32 %v1697_v19, %v2474_v43  ;;  %v1721_v24 = vadd.s32 4294967288, %v1719_v13  ;;  %v1725_v52 = vadd.s32 4294967280, %v1719_v13 }
  0xa0   :  { %v1658_v62 = vadd.f32 %v1657_v28, %v1171_v4  ;;  %1704 = vadd.xlane.f32.xlu0 %v1703_v7 }
  0xa2   :  { %1659 = vadd.xlane.f32.xlu2 %v1658_v62 }
  0xaa   :  { %1699 = vadd.xlane.f32.xlu2 %v1698_v2 }
  0xad   :  { %v1665_v12 = vpop.xlane.xlu2 %1664 }
  0xae   :  { %v1729_v35 = vperm.slane %v1665_v12, %v1719_v13 }
  0xc2   :  { %v1675_v29 = vpop.xlane.xlu2 %1674 }
  0xc3   :  { %v1732_v27 = vperm.slane %v1675_v29, %v1725_v52 }
  0xca   :  { %v1680_v56 = vpop.xlane.xlu2 %1679 }
  0xcb   :  { %v1734_v39 = vperm.slane %v1680_v56, %v1719_v13 }
  0xd9   :  { %v1685_v26 = vpop.xlane.xlu2 %1684  ;;  %v1670_v0 = vpop.xlane.xlu0 %1669 }
  0xda   :  { %v1730_v36 = vperm.slane %v1670_v0, %v1721_v24  ;;  %v1735_v54 = vperm.slane %v1685_v26, %v1721_v24 }
  0xdc   :  { %v1731_v63 = vsel %vm1723_vm8, %v1730_v36, %v1729_v35  ;;  %v1736_v59 = vsel %vm1723_vm8, %v1735_v54, %v1734_v39 }
  0xdd   :  { %v1733_v38 = vsel %vm1727_vm10, %v1732_v27, %v1731_v63 }
  0xe1   :  { %v1690_v1 = vpop.xlane.xlu2 %1689 }
  0xe2   :  { %v1737_v6 = vperm.slane %v1690_v1, %v1725_v52 }
  0xe4   :  { %v1738_v11 = vsel %vm1727_vm10, %v1737_v6, %v1736_v59 }
 0x103   :  { %v1650_v32 = vpop.xlane.xlu1 %1649 }
 0x104   :  { %v1720_v43 = vperm.slane %v1650_v32, %v1719_v13 }
 0x10c   :  { %v1655_v57 = vpop.xlane.xlu2 %1654 }
 0x10d   :  { %v1722_v22 = vperm.slane %v1655_v57, %v1721_v24 }
 0x10f   :  { %v1724_v3 = vsel %vm1723_vm8, %v1722_v22, %v1720_v43 }
 0x112   :  { %v1695_v50 = vpop.xlane.xlu1 %1694 }
 0x113   :  { %v1705_v40 = vpop.xlane.xlu0 %1704  ;;  %v1739_v48 = vperm.slane %v1695_v50, %v1719_v13 }
 0x114   :  { %v1742_v21 = vperm.slane %v1705_v40, %v1725_v52 }
 0x115   :  { %v1660_v55 = vpop.xlane.xlu2 %1659 }
 0x116   :  { %v1726_v46 = vperm.slane %v1660_v55, %v1725_v52 }
 0x118   :  { %v1728_v45 = vsel %vm1727_vm10, %v1726_v46, %v1724_v3 }
 0x119   :  { %v1745_v42 = vsel %vm1744_vm9, %v1733_v38, %v1728_v45 }
 0x11a   :  { %v1747_v51 = vsel %vm1746_vm11, %v1738_v11, %v1745_v42 }
 0x11d   :  { %v1700_v18 = vpop.xlane.xlu2 %1699 }
 0x11e   :  { %v1740_v61 = vperm.slane %v1700_v18, %v1721_v24 }
 0x120   :  { %v1741_v34 = vsel %vm1723_vm8, %v1740_v61, %v1739_v48 }
 0x121   :  { %v1743_v14 = vsel %vm1727_vm10, %v1742_v21, %v1741_v34 }
 0x122   :  { %v1749_v53 = vsel %vm1748_vm12, %v1743_v14, %v1747_v51 }
 0x123   :  { %1752 = vst.msk [vmem:[#allocation8] sm:$0xf] %vm1751_vm13, %v1749_v53 }
 0x124   :  { %1763 = dma.vmem_to_hbm [thread:$0]  %s1759_s28, 64, %s1761_s4, [#allocation5]  }
 0x125   :  { %1935 = dma.done.wait [#allocation5], 64  }
 0x126   :  { %1936 = vsyncadd [#allocation5], 4294967232 }
 0x127   :  { %1768 = vsyncpa [#allocation4], 1 }
 0x128   :  { %1769 = vsyncpa [#allocation7], 1 }
 0x129   :  { %1770 = vsyncpa [#allocation5], 1 }

</bundles_post_ra>
